<compile_context>
chip_gen: v5e
topology: v5e:2x2
jax: 0.10.0
libtpu: 0.0.40
codegen_flags: <defaults>
</compile_context>

<pallas_src>
import jax
import jax.numpy as jnp
from jax.experimental import pallas as pl
from jax.experimental.pallas import tpu as pltpu


def channel_attention_kernel(w1_ref, w2t_ref, x_ref, o_ref):
    # w1_ref : (mid, C) f32  -- first 1x1 conv weight (row m = weights of hidden unit m)
    # w2t_ref: (mid, C) f32  -- second 1x1 conv weight, transposed (row m = w2[:, m])
    # x_ref  : (Nb, C, HW)   -- lane-dense input tile (HW on the lane axis)
    # o_ref  : (Nb, C, HW)
    hw = x_ref.shape[-1]

    x = x_ref[...].astype(jnp.float32)                     # (Nb, C, HW)
    avg = jnp.sum(x, axis=-1) * (1.0 / hw)                 # (Nb, C) global avg pool
    mx = jnp.max(x, axis=-1)                               # (Nb, C) global max pool

    w1 = w1_ref[...]                                       # (mid, C)
    w2t = w2t_ref[...]                                     # (mid, C)

    def fc(v):                                             # (Nb, C) -> (Nb, C)
        # hidden_m = relu( sum_c v_c * w1[m, c] )  -- cross-lane reduction
        h = jnp.sum(v[:, None, :] * w1[None, :, :], axis=-1, keepdims=True)  # (Nb, mid, 1)
        h = jnp.maximum(h, 0.0)
        # out_c = sum_m hidden_m * w2[c, m]        -- sublane reduction
        return jnp.sum(h * w2t[None, :, :], axis=1)        # (Nb, C)

    gate = jax.nn.sigmoid(fc(avg) + fc(mx))                # (Nb, C)

    # Re-read the tile from VMEM for the gating multiply (bounds the vreg live
    # range of the big tile instead of keeping it resident across the MLP).
    o_ref[...] = (x_ref[...].astype(jnp.float32) * gate[:, :, None]).astype(o_ref.dtype)


def channel_attention(x, w1, w2, *, batch_block=None):
    """x: (N, C, H, W); w1: (mid, C, 1, 1) OIHW; w2: (C, mid, 1, 1) OIHW."""
    N, C, H, W = x.shape
    HW = H * W
    mid = w1.shape[0]
    assert w1.shape == (mid, C, 1, 1) and w2.shape == (C, mid, 1, 1)

    x_flat = x.reshape(N, C, HW)                           # lane-dense layout
    w1_2d = w1.reshape(mid, C).astype(jnp.float32)         # (mid, C)
    w2t_2d = w2.reshape(C, mid).T.astype(jnp.float32)      # (mid, C)

    if batch_block is None:
        # Amortize per-grid-step overhead: aim for >= ~512 KiB of input per
        # step (capped at N), keeping the block a divisor of N.
        bytes_per_img = C * HW * x.dtype.itemsize
        target = max(1, (512 * 1024) // max(bytes_per_img, 1))
        batch_block = 1
        for nb in range(1, N + 1):
            if N % nb == 0 and nb <= target:
                batch_block = nb
    grid = (N // batch_block,)

    # TODO(synk): for production feature maps on v7x (64 MiB VMEM), re-derive
    # batch_block against an explicit vmem_limit_bytes and/or tile HW.
    out_flat = pl.pallas_call(
        channel_attention_kernel,
        out_shape=jax.ShapeDtypeStruct((N, C, HW), x.dtype),
        grid_spec=pltpu.PrefetchScalarGridSpec(
            num_scalar_prefetch=0,
            grid=grid,
            in_specs=[
                pl.BlockSpec((mid, C), lambda n: (0, 0)),          # w1 (resident)
                pl.BlockSpec((mid, C), lambda n: (0, 0)),          # w2^T (resident)
                pl.BlockSpec((batch_block, C, HW), lambda n: (n, 0, 0)),
            ],
            out_specs=pl.BlockSpec((batch_block, C, HW), lambda n: (n, 0, 0)),
        ),
        compiler_params=pltpu.CompilerParams(
            # Batch blocks are independent -> shard across TensorCores (v7x).
            dimension_semantics=("parallel",)),
    )(w1_2d, w2t_2d, x_flat)
    return out_flat.reshape(N, C, H, W)


def channel_attention_ref(x, w1, w2):
    # Pure-JAX reference matching the PyTorch forward exactly.
    avg = jnp.mean(x, axis=(2, 3), keepdims=True)
    mx = jnp.max(x, axis=(2, 3), keepdims=True)

    def fc(v):
        h = jax.lax.conv_general_dilated(
            v, w1, (1, 1), "VALID",
            dimension_numbers=("NCHW", "OIHW", "NCHW"))
        h = jax.nn.relu(h)
        return jax.lax.conv_general_dilated(
            h, w2, (1, 1), "VALID",
            dimension_numbers=("NCHW", "OIHW", "NCHW"))

    return x * jax.nn.sigmoid(fc(avg) + fc(mx))


if __name__ == "__main__":
    key = jax.random.PRNGKey(0)
    kx, k1, k2 = jax.random.split(key, 3)

    # reduction=16 (module default) requires C >= 16; use C=32 -> mid=2.
    N, C, H, W = 2, 32, 16, 16
    reduction = 16
    mid = C // reduction

    x = jax.random.normal(kx, (N, C, H, W), dtype=jnp.float32)

    # Conv2d default init: uniform in [-1/sqrt(fan_in), 1/sqrt(fan_in)].
    b1 = 1.0 / jnp.sqrt(jnp.float32(C))        # fan_in of first 1x1 conv = C
    w1 = jax.random.uniform(k1, (mid, C, 1, 1), jnp.float32, minval=-b1, maxval=b1)
    b2 = 1.0 / jnp.sqrt(jnp.float32(mid))      # fan_in of second 1x1 conv = mid
    w2 = jax.random.uniform(k2, (C, mid, 1, 1), jnp.float32, minval=-b2, maxval=b2)

    out = channel_attention(x, w1, w2)
    out = jax.block_until_ready(out)

    ref = channel_attention_ref(x, w1, w2)
    assert out.shape == (N, C, H, W)
    assert jnp.allclose(out, ref, atol=1e-5, rtol=1e-5), (
        f"max abs err {jnp.max(jnp.abs(out - ref))}")
    print("KERNEL_OK")
</pallas_src>

<mosaic_0001>
module attributes {stable_mosaic.version = 11 : i64} {
  func.func @channel_attention_kernel(%arg0: i32, %arg1: memref<2x32xf32, #tpu.memory_space<vmem>>, %arg2: memref<2x32xf32, #tpu.memory_space<vmem>>, %arg3: memref<2x32x256xf32, #tpu.memory_space<vmem>>, %arg4: memref<2x32x256xf32, #tpu.memory_space<vmem>>) attributes {dimension_semantics = [#tpu.dimension_semantics<parallel>], iteration_bounds = array<i64: 1>, scalar_prefetch = 0 : i64, scratch_operands = 0 : i64, tpu.core_type = #tpu.core_type<tc>, window_params = [{pipeline_mode = #tpu.pipeline_mode<synchronous>, transform_indices = @transform_0, window_bounds = array<i64: 2, 32>}, {pipeline_mode = #tpu.pipeline_mode<synchronous>, transform_indices = @transform_1, window_bounds = array<i64: 2, 32>}, {transform_indices = @transform_2, window_bounds = array<i64: 2, 32, 256>}, {transform_indices = @transform_3, window_bounds = array<i64: 2, 32, 256>}]} {
    %c0 = arith.constant 0 : index
    %c0_0 = arith.constant 0 : index
    %c0_1 = arith.constant 0 : index
    %0 = vector.load %arg3[%c0, %c0_0, %c0_1] : memref<2x32x256xf32, #tpu.memory_space<vmem>>, vector<2x32x256xf32>
    %cst = arith.constant dense<0.000000e+00> : vector<2x32xf32>
    %1 = vector.multi_reduction <add>, %0, %cst [2] : vector<2x32x256xf32> to vector<2x32xf32>
    %cst_2 = arith.constant 3.906250e-03 : f32
    %2 = vector.broadcast %cst_2 : f32 to vector<2x32xf32>
    %3 = arith.mulf %1, %2 : vector<2x32xf32>
    %cst_3 = arith.constant dense<0xFF800000> : vector<2x32xf32>
    %4 = vector.multi_reduction <maximumf>, %0, %cst_3 [2] : vector<2x32x256xf32> to vector<2x32xf32>
    %c0_4 = arith.constant 0 : index
    %c0_5 = arith.constant 0 : index
    %5 = vector.load %arg1[%c0_4, %c0_5] : memref<2x32xf32, #tpu.memory_space<vmem>>, vector<2x32xf32>
    %c0_6 = arith.constant 0 : index
    %c0_7 = arith.constant 0 : index
    %6 = vector.load %arg2[%c0_6, %c0_7] : memref<2x32xf32, #tpu.memory_space<vmem>>, vector<2x32xf32>
    %7 = vector.shape_cast %3 : vector<2x32xf32> to vector<2x1x32xf32>
    %8 = vector.shape_cast %5 : vector<2x32xf32> to vector<1x2x32xf32>
    %9 = vector.broadcast %7 : vector<2x1x32xf32> to vector<2x2x32xf32>
    %10 = vector.broadcast %8 : vector<1x2x32xf32> to vector<2x2x32xf32>
    %11 = arith.mulf %9, %10 : vector<2x2x32xf32>
    %cst_8 = arith.constant dense<0.000000e+00> : vector<2x2xf32>
    %12 = vector.multi_reduction <add>, %11, %cst_8 [2] : vector<2x2x32xf32> to vector<2x2xf32>
    %13 = vector.shape_cast %12 : vector<2x2xf32> to vector<2x2x1xf32>
    %cst_9 = arith.constant 0.000000e+00 : f32
    %14 = vector.broadcast %cst_9 : f32 to vector<2x2x1xf32>
    %15 = arith.maximumf %13, %14 : vector<2x2x1xf32>
    %16 = vector.shape_cast %6 : vector<2x32xf32> to vector<1x2x32xf32>
    %17 = vector.broadcast %15 : vector<2x2x1xf32> to vector<2x2x32xf32>
    %18 = vector.broadcast %16 : vector<1x2x32xf32> to vector<2x2x32xf32>
    %19 = arith.mulf %17, %18 : vector<2x2x32xf32>
    %cst_10 = arith.constant dense<0.000000e+00> : vector<2x32xf32>
    %20 = vector.multi_reduction <add>, %19, %cst_10 [1] : vector<2x2x32xf32> to vector<2x32xf32>
    %21 = vector.shape_cast %4 : vector<2x32xf32> to vector<2x1x32xf32>
    %22 = vector.shape_cast %5 : vector<2x32xf32> to vector<1x2x32xf32>
    %23 = vector.broadcast %21 : vector<2x1x32xf32> to vector<2x2x32xf32>
    %24 = vector.broadcast %22 : vector<1x2x32xf32> to vector<2x2x32xf32>
    %25 = arith.mulf %23, %24 : vector<2x2x32xf32>
    %cst_11 = arith.constant dense<0.000000e+00> : vector<2x2xf32>
    %26 = vector.multi_reduction <add>, %25, %cst_11 [2] : vector<2x2x32xf32> to vector<2x2xf32>
    %27 = vector.shape_cast %26 : vector<2x2xf32> to vector<2x2x1xf32>
    %cst_12 = arith.constant 0.000000e+00 : f32
    %28 = vector.broadcast %cst_12 : f32 to vector<2x2x1xf32>
    %29 = arith.maximumf %27, %28 : vector<2x2x1xf32>
    %30 = vector.shape_cast %6 : vector<2x32xf32> to vector<1x2x32xf32>
    %31 = vector.broadcast %29 : vector<2x2x1xf32> to vector<2x2x32xf32>
    %32 = vector.broadcast %30 : vector<1x2x32xf32> to vector<2x2x32xf32>
    %33 = arith.mulf %31, %32 : vector<2x2x32xf32>
    %cst_13 = arith.constant dense<0.000000e+00> : vector<2x32xf32>
    %34 = vector.multi_reduction <add>, %33, %cst_13 [1] : vector<2x2x32xf32> to vector<2x32xf32>
    %35 = arith.addf %20, %34 : vector<2x32xf32>
    %36 = arith.negf %35 : vector<2x32xf32>
    %37 = math.exp %36 : vector<2x32xf32>
    %cst_14 = arith.constant 1.000000e+00 : f32
    %38 = vector.broadcast %cst_14 : f32 to vector<2x32xf32>
    %39 = arith.addf %38, %37 : vector<2x32xf32>
    %40 = arith.divf %38, %39 : vector<2x32xf32>
    %c0_15 = arith.constant 0 : index
    %c0_16 = arith.constant 0 : index
    %c0_17 = arith.constant 0 : index
    %41 = vector.load %arg3[%c0_15, %c0_16, %c0_17] : memref<2x32x256xf32, #tpu.memory_space<vmem>>, vector<2x32x256xf32>
    %42 = vector.shape_cast %40 : vector<2x32xf32> to vector<2x32x1xf32>
    %43 = vector.broadcast %42 : vector<2x32x1xf32> to vector<2x32x256xf32>
    %44 = arith.mulf %41, %43 : vector<2x32x256xf32>
    %c0_18 = arith.constant 0 : index
    %c0_19 = arith.constant 0 : index
    %c0_20 = arith.constant 0 : index
    %45 = vector.load %arg4[%c0_18, %c0_19, %c0_20] : memref<2x32x256xf32, #tpu.memory_space<vmem>>, vector<2x32x256xf32>
    tpu.vector_store %arg4[%c0_18, %c0_19, %c0_20], %44 {strides = array<i32>} : memref<2x32x256xf32, #tpu.memory_space<vmem>>, vector<2x32x256xf32>,
    return
  }
  func.func @transform_0(%arg0: i32) -> (i32, i32) {
    %c0_i32 = arith.constant 0 : i32
    %c0_i32_0 = arith.constant 0 : i32
    %c0_i32_1 = arith.constant 0 : i32
    return %c0_i32, %c0_i32_0 : i32, i32
  }
  func.func @transform_1(%arg0: i32) -> (i32, i32) {
    %c0_i32 = arith.constant 0 : i32
    %c0_i32_0 = arith.constant 0 : i32
    %c0_i32_1 = arith.constant 0 : i32
    return %c0_i32, %c0_i32_0 : i32, i32
  }
  func.func @transform_2(%arg0: i32) -> (i32, i32, i32) {
    %c0_i32 = arith.constant 0 : i32
    %c0_i32_0 = arith.constant 0 : i32
    %c0_i32_1 = arith.constant 0 : i32
    return %arg0, %c0_i32, %c0_i32_0 : i32, i32, i32
  }
  func.func @transform_3(%arg0: i32) -> (i32, i32, i32) {
    %c0_i32 = arith.constant 0 : i32
    %c0_i32_0 = arith.constant 0 : i32
    %c0_i32_1 = arith.constant 0 : i32
    return %arg0, %c0_i32, %c0_i32_0 : i32, i32, i32
  }
}

</mosaic_0001>

<bundles_post_ra>
// kernel: tpu_custom_call.1
= control target key start
LH: loop header
LB: loop body
LE: loop exit
PB: predicated region body
PF: predicated region fallthrough
CT: control target
= control target key end

     0   :  { %8 = vsyncpa [#allocation3], 0  ;;  %s1023_s0 = inlined_call_operand.hbm [shape: f32[2,32], index: 0, kind: input, shape index: {}]   ;;  %s1024_s1 = inlined_call_operand.hbm [shape: f32[2,32], index: 1, kind: input, shape index: {}]   ;;  %s1025_s2 = inlined_call_operand.hbm [shape: f32[2,32,256], index: 2, kind: input, shape index: {}]   ;;  %s1026_s3 = inlined_call_operand.hbm [shape: f32[2,32,256], index: 3, kind: output, shape index: {}]  }
   0x1   :  { %9 = vsyncpa [#allocation6], 0  ;;  %s27_s14 = sshll.u32 %s1024_s1, 4  ;;  %s28_s14 = int_to_ptr.hbm [resolvable:$true] %s27_s14 }
   0x2   :  { %10 = vsyncpa [#allocation4], 0  ;;  %s751_s15 = smov [#allocation5]   ;;  %s16_s19 = sshll.u32 %s1023_s0, 4  ;;  %s17_s19 = int_to_ptr.hbm [resolvable:$true] %s16_s19 }
   0x3   :  { %s29_s16 = sshll.u32 %s751_s15, 4  ;;  %s752_s20 = smov [#allocation2]   ;;  %s30_s16 = int_to_ptr.vmem [resolvable:$true] %s29_s16 }
   0x4   :  { %32 = dma.hbm_to_vmem [thread:$0]  %s28_s14, 32, %s30_s16, [#allocation6]  }
   0x5   :  { %s18_s21 = sshll.u32 %s752_s20, 4  ;;  %s37_s24 = sshll.u32 %s1025_s2, 4  ;;  %s19_s21 = int_to_ptr.vmem [resolvable:$true] %s18_s21  ;;  %s38_s24 = int_to_ptr.hbm [resolvable:$true] %s37_s24 }
   0x6   :  { %21 = dma.hbm_to_vmem [thread:$0]  %s17_s19, 32, %s19_s21, [#allocation3]  }
   0x7   :  { %s753_s1 = smov [#allocation7]   ;;  %s754_s26 = smov 256  }
   0x8   :  { %s39_s25 = sshll.u32 %s753_s1, 4  ;;  %s755_s27 = smov 16   ;;  %s40_s25 = int_to_ptr.vmem [resolvable:$true] %s39_s25 }
   0x9   :  { %45 = dma.hbm_to_vmem [thread:$0]  %s38_s24, 2048, %s40_s25, [#allocation6], %s754_s26, %s754_s26, %s755_s27  }
   0xa   :  { %745 = dma.done.wait [#allocation3], 32  }
   0xb   :  { %746 = vsyncadd [#allocation3], 4294967264 }
   0xc   :  { %747 = dma.done.wait [#allocation6], 2080  }
   0xd   :  { %748 = vsyncadd [#allocation6], 4294965216  ;;  %v790_v0 = vld [vmem:[#allocation7 + $0x40] sm:$0xff]  ;;  %v792_v1 = vld [vmem:[#allocation7 + $0x48] sm:$0xff]  ;;  %v134_v19 = vlaneseq  ;;  %v756_v48 = vmov 0   ;;  %vm276_vm0 = vcmask 130112  }
   0xe   :  { %v794_v2 = vld [vmem:[#allocation7 + $0x20] sm:$0xff]  ;;  %v86_v3 = vadd.f32 %v792_v1, %v790_v0  ;;  %v798_v4 = vld [vmem:[#allocation7 + $0x28] sm:$0xff]  ;;  %v808_v9 = vld [vmem:[#allocation7 + $0x50] sm:$0xff]  ;;  %v118_v34 = vmax.f32 %v790_v0, %v792_v1  ;;  %vm280_vm1 = vcmask 195712   ;;  %vm284_vm2 = vcmask 261312   ;;  %s757_s0 = smov [#allocation8]  }
   0xf   :  { %v800_v5 = vld [vmem:[#allocation7] sm:$0xff]  ;;  %v802_v6 = vld [vmem:[#allocation7 + $0x8] sm:$0xff]  ;;  %v80_v7 = vadd.f32 %v798_v4, %v794_v2  ;;  %v810_v10 = vld [vmem:[#allocation7 + $0x58] sm:$0xff]  ;;  %v835_v23 = vshrl.u32 %v134_v19, 7  ;;  %v112_v30 = vmax.f32 %v794_v2, %v798_v4  ;;  %vm307_vm3 = vcmask 1041409   ;;  %s597_s2 = sshll.u32 %s757_s0, 4  ;;  %s598_s2 = int_to_ptr.vmem [resolvable:$true] %s597_s2 }
  0x10   :  { %v74_v8 = vadd.f32 %v802_v6, %v800_v5  ;;  %87 = vadd.xlane.f32.xlu2 %v86_v3  ;;  %v812_v11 = vld [vmem:[#allocation7 + $0x30] sm:$0xff]  ;;  %v814_v12 = vld [vmem:[#allocation7 + $0x38] sm:$0xff]  ;;  %v89_v15 = vadd.f32 %v810_v10, %v808_v9  ;;  %v830_v21 = vld [vmem:[#allocation7 + $0x60] sm:$0xff]  ;;  %v106_v24 = vmax.f32 %v800_v5, %v802_v6  ;;  %v121_v33 = vmax.f32 %v808_v9, %v810_v10  ;;  %s599_s30 = sshll.u32 %s1026_s3, 4  ;;  %s600_s30 = int_to_ptr.hbm [resolvable:$true] %s599_s30 }
  0x11   :  { %81 = vadd.xlane.f32.xlu1 %v80_v7  ;;  %v816_v13 = vld [vmem:[#allocation7 + $0x10] sm:$0xff]  ;;  %v818_v14 = vld [vmem:[#allocation7 + $0x18] sm:$0xff]  ;;  %v83_v16 = vadd.f32 %v814_v12, %v812_v11  ;;  %v832_v22 = vld [vmem:[#allocation7 + $0x68] sm:$0xff]  ;;  %v844_v27 = vadd.s32 8, %v835_v23  ;;  %v848_v28 = vadd.s32 16, %v835_v23  ;;  %v115_v29 = vmax.f32 %v812_v11, %v814_v12 }
  0x12   :  { %75 = vadd.xlane.f32.xlu0 %v74_v8  ;;  %v77_v17 = vadd.f32 %v818_v14, %v816_v13  ;;  %v826_v18 = vld [vmem:[#allocation7 + $0x70] sm:$0xff]  ;;  %v828_v20 = vld [vmem:[#allocation7 + $0x78] sm:$0xff]  ;;  %v92_v26 = vadd.f32 %v832_v22, %v830_v21  ;;  %622 = vset.pattern.permute.xlu1 %v835_v23  ;;  %v109_v31 = vmax.f32 %v816_v13, %v818_v14  ;;  %v867_v38 = vadd.s32 24, %v835_v23 }
  0x13   :  { %v95_v25 = vadd.f32 %v828_v20, %v826_v18  ;;  %623 = vset.pattern.permute.xlu2 %v844_v27  ;;  %624 = vset.pattern.permute.xlu0 %v848_v28  ;;  %v124_v32 = vmax.f32 %v830_v21, %v832_v22  ;;  %v127_v35 = vmax.f32 %v826_v18, %v828_v20  ;;  %v130_v36 = vld [vmem:[#allocation2] sm:$0x3]  ;;  %vm312_vm4 = vcmask 254976  }
  0x14   :  { %v133_v37 = vperm.slane %v130_v36, 0  ;;  %v158_v39 = vperm.slane %v130_v36, 1 }
  0x18   :  { %90 = vadd.xlane.f32.xlu2 %v89_v15 }
  0x19   :  { %84 = vadd.xlane.f32.xlu1 %v83_v16 }
  0x1a   :  { %78 = vadd.xlane.f32.xlu0 %v77_v17 }
  0x20   :  { %107 = vmax.xlane.f32.xlu2 %v106_v24 }
  0x21   :  { %96 = vadd.xlane.f32.xlu1 %v95_v25 }
  0x22   :  { %93 = vadd.xlane.f32.xlu0 %v92_v26 }
  0x28   :  { %116 = vmax.xlane.f32.xlu2 %v115_v29 }
  0x29   :  { %113 = vmax.xlane.f32.xlu1 %v112_v30 }
  0x2a   :  { %110 = vmax.xlane.f32.xlu0 %v109_v31 }
  0x30   :  { %125 = vmax.xlane.f32.xlu2 %v124_v32 }
  0x31   :  { %122 = vmax.xlane.f32.xlu1 %v121_v33 }
  0x32   :  { %119 = vmax.xlane.f32.xlu0 %v118_v34 }
  0x3a   :  { %128 = vmax.xlane.f32.xlu0 %v127_v35 }
  0x48   :  { %144 = vperm.xlu2 %623, %v133_v37  }
  0x4a   :  { %138 = vperm.xlu1 %622, %v133_v37  }
  0x4e   :  { %150 = vperm.xlu0 %624, %v133_v37  }
  0x50   :  { %625 = vset.pattern.permute.xlu2 %v867_v38 }
  0x52   :  { %163 = vperm.xlu1 %622, %v158_v39  }
  0x56   :  { %631 = vset.pattern.permute.xlu0 %v756_v48 }
  0x58   :  { %156 = vperm.xlu2 %625, %v133_v37  }
  0x5a   :  { %627 = vset.pattern.permute.xlu1 %v848_v28 }
  0x60   :  { %626 = vset.pattern.permute.xlu2 %v844_v27 }
  0x62   :  { %175 = vperm.xlu1 %627, %v158_v39  }
  0x68   :  { %169 = vperm.xlu2 %626, %v158_v39  }
  0x6a   :  { %629 = vset.pattern.permute.xlu1 %v756_v48 }
  0x70   :  { %628 = vset.pattern.permute.xlu2 %v867_v38 }
  0x78   :  { %181 = vperm.xlu2 %628, %v158_v39  }
  0x80   :  { %630 = vset.pattern.permute.xlu2 %v756_v48 }
  0x83   :  { %v88_v40 = vpop.xlane.xlu2 %87 }
  0x84   :  { %v82_v42 = vpop.xlane.xlu1 %81  ;;  %v102_v7 = vmul.f32 0.00390625, %v88_v40 }
  0x85   :  { %v76_v43 = vpop.xlane.xlu0 %75  ;;  %v100_v29 = vmul.f32 0.00390625, %v82_v42 }
  0x86   :  { %v98_v59 = vmul.f32 0.00390625, %v76_v43 }
  0x8b   :  { %v91_v41 = vpop.xlane.xlu2 %90 }
  0x8c   :  { %v85_v45 = vpop.xlane.xlu1 %84  ;;  %v103_v43 = vmul.f32 0.00390625, %v91_v41 }
  0x8d   :  { %v79_v46 = vpop.xlane.xlu0 %78  ;;  %v101_v30 = vmul.f32 0.00390625, %v85_v45 }
  0x8e   :  { %v99_v25 = vmul.f32 0.00390625, %v79_v46 }
  0x93   :  { %v873_v44 = vpop.xlane.xlu2 %107 }
  0x94   :  { %v97_v49 = vpop.xlane.xlu1 %96 }
  0x95   :  { %v94_v50 = vpop.xlane.xlu0 %93  ;;  %v105_v42 = vmul.f32 0.00390625, %v97_v49 }
  0x96   :  { %v104_v40 = vmul.f32 0.00390625, %v94_v50 }
  0x9b   :  { %v875_v47 = vpop.xlane.xlu2 %116 }
  0x9c   :  { %v879_v52 = vpop.xlane.xlu1 %113 }
  0x9d   :  { %v881_v54 = vpop.xlane.xlu0 %110 }
  0xa3   :  { %v877_v51 = vpop.xlane.xlu2 %125 }
  0xa4   :  { %v123_v56 = vpop.xlane.xlu1 %122 }
  0xa5   :  { %v120_v58 = vpop.xlane.xlu0 %119 }
  0xab   :  { %v145_v53 = vpop.permute.xlu2 %144 }
  0xac   :  { %v192_v31 = vmul.f32 %v145_v53, %v99_v25  ;;  %v200_v45 = vmul.f32 %v145_v53, %v103_v43  ;;  %v338_v41 = vmul.f32 %v145_v53, %v881_v54 }
  0xad   :  { %v891_v63 = vpop.xlane.xlu0 %128 }
  0xb3   :  { %v883_v55 = vpop.permute.xlu2 %156 }
  0xb4   :  { %v887_v57 = vmul.f32 %v883_v55, %v875_v47  ;;  %v194_v33 = vmul.f32 %v883_v55, %v101_v30  ;;  %v202_v48 = vmul.f32 %v883_v55, %v105_v42 }
  0xbc   :  { %v139_v60 = vpop.permute.xlu1 %138 }
  0xbd   :  { %v191_v61 = vmul.f32 %v139_v60, %v98_v59  ;;  %v889_v62 = vmul.f32 %v139_v60, %v120_v58  ;;  %v199_v24 = vmul.f32 %v139_v60, %v102_v7 }
  0xbf   :  { %224 = vperm.xlu1 %629, %v191_v61  }
  0xc0   :  { %v151_v26 = vpop.permute.xlu0 %150 }
  0xc1   :  { %v193_v32 = vmul.f32 %v151_v26, %v100_v29  ;;  %v201_v46 = vmul.f32 %v151_v26, %v104_v40  ;;  %v347_v49 = vmul.f32 %v151_v26, %v877_v51 }
  0xc2   :  { %v170_v3 = vpop.permute.xlu2 %169 }
  0xc3   :  { %v893_v8 = vmul.f32 %v170_v3, %v123_v56  ;;  %v196_v39 = vmul.f32 %v170_v3, %v99_v25  ;;  %v204_v61 = vmul.f32 %v170_v3, %v103_v43 }
  0xc4   :  { %v164_v15 = vpop.permute.xlu1 %163 }
  0xc5   :  { %v203_v16 = vmul.f32 %v164_v15, %v102_v7  ;;  %v195_v17 = vmul.f32 %v164_v15, %v98_v59  ;;  %v341_v25 = vmul.f32 %v164_v15, %v873_v44 }
  0xc7   :  { %260 = vperm.xlu0 %631, %v203_v16   ;;  %236 = vperm.xlu2 %630, %v195_v17   ;;  %v337_v16 = vmul.f32 %v139_v60, %v873_v44  ;;  %v346_v17 = vmul.f32 %v145_v53, %v123_v56  ;;  %v348_v56 = vmul.f32 %v883_v55, %v891_v63 }
  0xc8   :  { %248 = vperm.xlu1 %629, %v199_v24   ;;  %v349_v24 = vmul.f32 %v164_v15, %v120_v58  ;;  %v342_v58 = vmul.f32 %v170_v3, %v881_v54  ;;  %v339_v44 = vmul.f32 %v151_v26, %v879_v52 }
  0xcf   :  { %227 = vperm.xlu0 %631, %v192_v31   ;;  %230 = vperm.xlu2 %630, %v193_v32  }
  0xd0   :  { %233 = vperm.xlu1 %629, %v194_v33  }
  0xd2   :  { %v182_v34 = vpop.permute.xlu2 %181 }
  0xd3   :  { %v198_v35 = vmul.f32 %v182_v34, %v101_v30  ;;  %v206_v59 = vmul.f32 %v182_v34, %v105_v42  ;;  %v352_v54 = vmul.f32 %v182_v34, %v891_v63 }
  0xd4   :  { %v176_v36 = vpop.permute.xlu1 %175 }
  0xd5   :  { %v197_v37 = vmul.f32 %v176_v36, %v100_v29  ;;  %v205_v7 = vmul.f32 %v176_v36, %v104_v40  ;;  %v351_v50 = vmul.f32 %v176_v36, %v877_v51  ;;  %v344_v29 = vmul.f32 %v182_v34, %v875_v47 }
  0xd6   :  { %v343_v47 = vmul.f32 %v176_v36, %v879_v52 }
  0xd7   :  { %242 = vperm.xlu0 %631, %v197_v37   ;;  %245 = vperm.xlu2 %630, %v198_v35  }
  0xd8   :  { %239 = vperm.xlu1 %629, %v196_v39  }
  0xdf   :  { %251 = vperm.xlu0 %631, %v200_v45   ;;  %254 = vperm.xlu2 %630, %v201_v46  }
  0xe0   :  { %257 = vperm.xlu1 %629, %v202_v48  }
  0xe7   :  { %269 = vperm.xlu0 %631, %v206_v59   ;;  %263 = vperm.xlu2 %630, %v204_v61  }
  0xe8   :  { %266 = vperm.xlu1 %629, %v205_v7  }
  0xef   :  { %370 = vperm.xlu0 %631, %v337_v16   ;;  %397 = vperm.xlu2 %630, %v346_v17  }
  0xf0   :  { %406 = vperm.xlu1 %629, %v349_v24  }
  0xf7   :  { %373 = vperm.xlu0 %631, %v338_v41   ;;  %400 = vperm.xlu2 %630, %v347_v49  }
  0xf8   :  { %412 = vperm.xlu1 %629, %v351_v50  }
  0xff   :  { %382 = vperm.xlu0 %631, %v341_v25   ;;  %391 = vperm.xlu2 %630, %v344_v29  }
 0x100   :  { %403 = vperm.xlu1 %629, %v348_v56  }
 0x107   :  { %385 = vperm.xlu0 %631, %v342_v58   ;;  %635 = vset.pattern.permute.xlu2 %v867_v38 }
 0x108   :  { %636 = vset.pattern.permute.xlu1 %v835_v23 }
 0x10f   :  { %394 = vperm.xlu0 %631, %v889_v62   ;;  %v915_v62 = vand.u32 127, %v134_v19 }
 0x111   :  { %v919_v15 = vadd.s32 4294967288, %v915_v62  ;;  %v923_v30 = vadd.s32 4294967280, %v915_v62  ;;  %v927_v31 = vadd.s32 4294967272, %v915_v62 }
 0x117   :  { %409 = vperm.xlu0 %631, %v893_v8  }
 0x11f   :  { %376 = vperm.xlu0 %631, %v339_v44  }
 0x121   :  { %v237_v51 = vpop.permute.xlu2 %236 }
 0x122   :  { %v286_v35 = vperm.slane %v237_v51, %v915_v62 }
 0x127   :  { %388 = vperm.xlu0 %631, %v343_v47  }
 0x129   :  { %v231_v55 = vpop.permute.xlu2 %230 }
 0x12a   :  { %v279_v32 = vperm.slane %v231_v55, %v923_v30 }
 0x12f   :  { %379 = vperm.xlu0 %631, %v887_v57  }
 0x131   :  { %v225_v53 = vpop.permute.xlu1 %224  ;;  %v246_v8 = vpop.permute.xlu2 %245 }
 0x132   :  { %v273_v63 = vperm.slane %v225_v53, %v915_v62  ;;  %v291_v40 = vperm.slane %v246_v8, %v927_v31 }
 0x137   :  { %415 = vperm.xlu0 %631, %v352_v54  }
 0x139   :  { %v261_v60 = vpop.permute.xlu0 %260  ;;  %v255_v36 = vpop.permute.xlu2 %254 }
 0x13a   :  { %v249_v3 = vpop.permute.xlu1 %248  ;;  %v296_v25 = vperm.slane %v255_v36, %v923_v30  ;;  %v300_v56 = vperm.slane %v261_v60, %v915_v62 }
 0x13b   :  { %v293_v41 = vperm.slane %v249_v3, %v915_v62 }
 0x13f   :  { %632 = vset.pattern.permute.xlu0 %v835_v23 }
 0x141   :  { %v228_v52 = vpop.permute.xlu0 %227  ;;  %v264_v24 = vpop.permute.xlu2 %263 }
 0x142   :  { %v234_v26 = vpop.permute.xlu1 %233  ;;  %v275_v57 = vperm.slane %v228_v52, %v919_v15  ;;  %v301_v49 = vperm.slane %v264_v24, %v919_v15 }
 0x143   :  { %v283_v43 = vperm.slane %v234_v26, %v927_v31 }
 0x144   :  { %v277_v19 = vsel %vm276_vm0, %v275_v57, %v273_v63  ;;  %v302_v53 = vsel %vm276_vm0, %v301_v49, %v300_v56 }
 0x145   :  { %v281_v39 = vsel %vm280_vm1, %v279_v32, %v277_v19 }
 0x146   :  { %v285_v45 = vsel %vm284_vm2, %v283_v43, %v281_v39 }
 0x149   :  { %v243_v23 = vpop.permute.xlu0 %242 }
 0x14a   :  { %v240_v33 = vpop.permute.xlu1 %239  ;;  %v289_v34 = vperm.slane %v243_v23, %v923_v30 }
 0x14b   :  { %v287_v37 = vperm.slane %v240_v33, %v919_v15  ;;  %v398_v33 = vpop.permute.xlu2 %397 }
 0x14d   :  { %v288_v46 = vsel %vm276_vm0, %v287_v37, %v286_v35 }
 0x14e   :  { %v290_v42 = vsel %vm280_vm1, %v289_v34, %v288_v46 }
 0x14f   :  { %v292_v48 = vsel %vm284_vm2, %v291_v40, %v290_v42 }
 0x150   :  { %v308_v59 = vsel %vm307_vm3, %v292_v48, %v285_v45 }
 0x151   :  { %v313_v61 = vsel %vm312_vm4, %v308_v59, 0.0  ;;  %v252_v7 = vpop.permute.xlu0 %251 }
 0x152   :  { %v258_v16 = vpop.permute.xlu1 %257  ;;  %314 = vadd.xlane.f32.xlu2 %v313_v61  ;;  %v294_v17 = vperm.slane %v252_v7, %v919_v15 }
 0x153   :  { %v298_v54 = vperm.slane %v258_v16, %v927_v31  ;;  %v401_v36 = vpop.permute.xlu2 %400 }
 0x154   :  { %v295_v50 = vsel %vm276_vm0, %v294_v17, %v293_v41 }
 0x155   :  { %v297_v51 = vsel %vm280_vm1, %v296_v25, %v295_v50  ;;  %v432_v25 = vperm.slane %v398_v33, %v919_v15  ;;  %v131_v33 = vld [vmem:[#allocation5] sm:$0x3] }
 0x156   :  { %v299_v3 = vsel %vm284_vm2, %v298_v54, %v297_v51  ;;  %v434_v54 = vperm.slane %v401_v36, %v923_v30 }
 0x159   :  { %v270_v29 = vpop.permute.xlu0 %269 }
 0x15a   :  { %v267_v58 = vpop.permute.xlu1 %266  ;;  %v305_v44 = vperm.slane %v270_v29, %v927_v31 }
 0x15b   :  { %v303_v47 = vperm.slane %v267_v58, %v923_v30  ;;  %v392_v45 = vpop.permute.xlu2 %391 }
 0x15c   :  { %v429_v17 = vperm.slane %v392_v45, %v927_v31 }
 0x15d   :  { %v304_v55 = vsel %vm280_vm1, %v303_v47, %v302_v53 }
 0x15e   :  { %v306_v8 = vsel %vm284_vm2, %v305_v44, %v304_v55 }
 0x15f   :  { %v309_v52 = vsel %vm307_vm3, %v306_v8, %v299_v3 }
 0x160   :  { %v316_v60 = vsel %vm312_vm4, %v309_v52, 0.0 }
 0x161   :  { %317 = vadd.xlane.f32.xlu1 %v316_v60  ;;  %v371_v26 = vpop.permute.xlu0 %370 }
 0x162   :  { %v407_v35 = vpop.permute.xlu1 %406  ;;  %v417_v59 = vperm.slane %v371_v26, %v915_v62 }
 0x163   :  { %v438_v47 = vperm.slane %v407_v35, %v915_v62 }
 0x169   :  { %v374_v57 = vpop.permute.xlu0 %373 }
 0x16a   :  { %v413_v40 = vpop.permute.xlu1 %412  ;;  %v418_v46 = vperm.slane %v374_v57, %v919_v15 }
 0x16c   :  { %v419_v24 = vsel %vm276_vm0, %v418_v46, %v417_v59 }
 0x171   :  { %v383_v63 = vpop.permute.xlu0 %382 }
 0x172   :  { %v424_v42 = vperm.slane %v383_v63, %v915_v62  ;;  %v404_v55 = vpop.permute.xlu1 %403 }
 0x173   :  { %v436_v60 = vperm.slane %v404_v55, %v927_v31 }
 0x179   :  { %v386_v19 = vpop.permute.xlu0 %385 }
 0x17a   :  { %v425_v39 = vperm.slane %v386_v19, %v919_v15 }
 0x17c   :  { %v426_v61 = vsel %vm276_vm0, %v425_v39, %v424_v42 }
 0x181   :  { %v395_v23 = vpop.permute.xlu0 %394 }
 0x182   :  { %v431_v41 = vperm.slane %v395_v23, %v915_v62 }
 0x184   :  { %v433_v51 = vsel %vm276_vm0, %v432_v25, %v431_v41 }
 0x185   :  { %v435_v52 = vsel %vm280_vm1, %v434_v54, %v433_v51 }
 0x186   :  { %v437_v57 = vsel %vm284_vm2, %v436_v60, %v435_v52 }
 0x189   :  { %v410_v32 = vpop.permute.xlu0 %409 }
 0x18a   :  { %v439_v29 = vperm.slane %v410_v32, %v919_v15  ;;  %v441_v15 = vperm.slane %v413_v40, %v923_v30 }
 0x18c   :  { %v440_v3 = vsel %vm276_vm0, %v439_v29, %v438_v47 }
 0x18d   :  { %v442_v62 = vsel %vm280_vm1, %v441_v15, %v440_v3 }
 0x191   :  { %v377_v34 = vpop.permute.xlu0 %376 }
 0x192   :  { %v420_v48 = vperm.slane %v377_v34, %v923_v30 }
 0x194   :  { %v421_v50 = vsel %vm280_vm1, %v420_v48, %v419_v24 }
 0x199   :  { %v389_v37 = vpop.permute.xlu0 %388 }
 0x19a   :  { %v427_v43 = vperm.slane %v389_v37, %v923_v30 }
 0x19c   :  { %v428_v7 = vsel %vm280_vm1, %v427_v43, %v426_v61 }
 0x19d   :  { %v430_v58 = vsel %vm284_vm2, %v429_v17, %v428_v7 }
 0x1a1   :  { %v380_v16 = vpop.permute.xlu0 %379 }
 0x1a2   :  { %v422_v49 = vperm.slane %v380_v16, %v927_v31 }
 0x1a4   :  { %v423_v56 = vsel %vm284_vm2, %v422_v49, %v421_v50 }
 0x1a5   :  { %v445_v44 = vsel %vm307_vm3, %v430_v58, %v423_v56 }
 0x1a6   :  { %v449_v53 = vsel %vm312_vm4, %v445_v44, 0.0 }
 0x1a7   :  { %450 = vadd.xlane.f32.xlu2 %v449_v53 }
 0x1a9   :  { %v416_v8 = vpop.permute.xlu0 %415 }
 0x1aa   :  { %v443_v26 = vperm.slane %v416_v8, %v927_v31 }
 0x1ac   :  { %v444_v63 = vsel %vm284_vm2, %v443_v26, %v442_v62 }
 0x1ad   :  { %v446_v19 = vsel %vm307_vm3, %v444_v63, %v437_v57 }
 0x1ae   :  { %v452_v23 = vsel %vm312_vm4, %v446_v19, 0.0 }
 0x1af   :  { %453 = vadd.xlane.f32.xlu1 %v452_v23 }
 0x1c5   :  { %v315_v32 = vpop.xlane.xlu2 %314 }
 0x1c6   :  { %v319_v30 = vmax.f32 %v315_v32, 0.0 }
 0x1c8   :  { %v321_v34 = vmul.f32 %v319_v30, %v131_v33 }
 0x1ca   :  { %v323_v36 = vsel %vm312_vm4, %v321_v34, 0.0 }
 0x1cb   :  { %v324_v31 = vrot.slane %v323_v36, 4 }
 0x1cd   :  { %v325_v40 = vadd.f32 %v324_v31, %v323_v36 }
 0x1cf   :  { %v326_v48 = vrot.slane %v325_v40, 2 }
 0x1d1   :  { %v327_v16 = vadd.f32 %v326_v48, %v325_v40 }
 0x1d3   :  { %v328_v29 = vrot.slane %v327_v16, 1 }
 0x1d4   :  { %v318_v35 = vpop.xlane.xlu1 %317 }
 0x1d5   :  { %v320_v37 = vmax.f32 %v318_v35, 0.0  ;;  %v329_v53 = vadd.f32 %v328_v29, %v327_v16 }
 0x1d7   :  { %v322_v39 = vmul.f32 %v320_v37, %v131_v33 }
 0x1d9   :  { %v330_v46 = vsel %vm312_vm4, %v322_v39, 0.0 }
 0x1da   :  { %v331_v59 = vrot.slane %v330_v46, 4 }
 0x1dc   :  { %v332_v17 = vadd.f32 %v331_v59, %v330_v46 }
 0x1de   :  { %v333_v56 = vrot.slane %v332_v17, 2 }
 0x1e0   :  { %v334_v54 = vadd.f32 %v333_v56, %v332_v17 }
 0x1e2   :  { %v335_v52 = vrot.slane %v334_v54, 1 }
 0x1e4   :  { %v336_v57 = vadd.f32 %v335_v52, %v334_v54 }
 0x21a   :  { %v451_v43 = vpop.xlane.xlu2 %450 }
 0x21b   :  { %v455_v42 = vmax.f32 %v451_v43, 0.0 }
 0x21d   :  { %v457_v45 = vmul.f32 %v455_v42, %v131_v33 }
 0x21f   :  { %v459_v61 = vsel %vm312_vm4, %v457_v45, 0.0 }
 0x220   :  { %v460_v7 = vrot.slane %v459_v61, 4 }
 0x222   :  { %v461_v24 = vadd.f32 %v460_v7, %v459_v61  ;;  %v454_v41 = vpop.xlane.xlu1 %453 }
 0x223   :  { %v456_v49 = vmax.f32 %v454_v41, 0.0 }
 0x224   :  { %v462_v50 = vrot.slane %v461_v24, 2 }
 0x225   :  { %v458_v25 = vmul.f32 %v456_v49, %v131_v33 }
 0x226   :  { %v463_v58 = vadd.f32 %v462_v50, %v461_v24 }
 0x227   :  { %v466_v44 = vsel %vm312_vm4, %v458_v25, 0.0 }
 0x228   :  { %v464_v47 = vrot.slane %v463_v58, 1  ;;  %v467_v51 = vrot.slane %v466_v44, 4 }
 0x22a   :  { %v465_v55 = vadd.f32 %v464_v47, %v463_v58  ;;  %v468_v3 = vadd.f32 %v467_v51, %v466_v44 }
 0x22c   :  { %v473_v15 = vadd.f32 %v465_v55, %v329_v53  ;;  %v469_v8 = vrot.slane %v468_v3, 2 }
 0x22e   :  { %v613_v60 = vmul.f32 -1.442695, %v473_v15  ;;  %v470_v26 = vadd.f32 %v469_v8, %v468_v3 }
 0x230   :  { %641 = vpow2.f32 %v613_v60  ;;  %v471_v62 = vrot.slane %v470_v26, 1 }
 0x232   :  { %v472_v63 = vadd.f32 %v471_v62, %v470_v26 }
 0x234   :  { %v474_v19 = vadd.f32 %v472_v63, %v336_v57 }
 0x236   :  { %v642_v23 = vpop.eup %641  ;;  %v614_v32 = vmul.f32 -1.442695, %v474_v19 }
 0x237   :  { %v481_v30 = vadd.f32 1.0, %v642_v23 }
 0x238   :  { %643 = vpow2.f32 %v614_v32 }
 0x239   :  { %645 = vrcp.f32 %v481_v30  ;;  %v494_v31 = vand.u32 2147483648, %v481_v30  ;;  %v492_v40 = vand.u32 2147483647, %v481_v30  ;;  %vm488_vm6 = vweird.f32 %v481_v30 }
 0x23b   :  { %v495_v42 = vor.u32 1.1754944e-38, %v494_v31  ;;  %vm493_vm8 = vcmp.eq.f32.partialorder %v492_v40, 8.507059e+37 }
 0x23e   :  { %v644_v33 = vpop.eup %643 }
 0x23f   :  { %v646_v34 = vpop.eup %645  ;;  %v482_v35 = vadd.f32 1.0, %v644_v33 }
 0x240   :  { %v484_v36 = vmul.f32 %v646_v34, %v481_v30  ;;  %vm489_vm5 = vweird.f32 %v646_v34 }
 0x241   :  { %647 = vrcp.f32 %v482_v35  ;;  %vm490_vm7 = vmor %vm488_vm6, %vm489_vm5  ;;  %v509_v7 = vand.u32 2147483648, %v482_v35  ;;  %v507_v17 = vand.u32 2147483647, %v482_v35  ;;  %vm503_vm10 = vweird.f32 %v482_v35 }
 0x242   :  { %v485_v37 = vsub.f32 1.0, %v484_v36 }
 0x243   :  { %v510_v41 = vor.u32 1.1754944e-38, %v509_v7  ;;  %vm508_vm12 = vcmp.eq.f32.partialorder %v507_v17, 8.507059e+37 }
 0x244   :  { %v486_v39 = vmul.f32 %v646_v34, %v485_v37 }
 0x246   :  { %v487_v43 = vadd.f32 %v646_v34, %v486_v39 }
 0x247   :  { %v648_v46 = vpop.eup %647 }
 0x248   :  { %v491_v45 = vsel %vm490_vm7, %v646_v34, %v487_v43  ;;  %v499_v48 = vmul.f32 %v648_v46, %v482_v35  ;;  %vm504_vm9 = vweird.f32 %v648_v46 }
 0x249   :  { %v496_v59 = vsel %vm493_vm8, %v495_v42, %v491_v45  ;;  %vm505_vm11 = vmor %vm503_vm10, %vm504_vm9 }
 0x24a   :  { %535 = vperm.xlu2 %635, %v496_v59   ;;  %517 = vperm.xlu0 %632, %v496_v59   ;;  %v500_v61 = vsub.f32 1.0, %v499_v48 }
 0x24c   :  { %v501_v16 = vmul.f32 %v648_v46, %v500_v61 }
 0x24e   :  { %v502_v24 = vadd.f32 %v648_v46, %v501_v16 }
 0x250   :  { %v506_v49 = vsel %vm505_vm11, %v648_v46, %v502_v24 }
 0x251   :  { %v511_v50 = vsel %vm508_vm12, %v510_v41, %v506_v49 }
 0x252   :  { %638 = vset.pattern.permute.xlu2 %v848_v28  ;;  %633 = vset.pattern.permute.xlu0 %v844_v27 }
 0x253   :  { %541 = vperm.xlu1 %636, %v511_v50  }
 0x25a   :  { %523 = vperm.xlu0 %633, %v496_v59   ;;  %553 = vperm.xlu2 %638, %v511_v50  }
 0x25b   :  { %639 = vset.pattern.permute.xlu1 %v867_v38 }
 0x262   :  { %634 = vset.pattern.permute.xlu0 %v848_v28 }
 0x263   :  { %559 = vperm.xlu1 %639, %v511_v50  }
 0x26a   :  { %529 = vperm.xlu0 %634, %v496_v59  }
 0x272   :  { %637 = vset.pattern.permute.xlu0 %v844_v27 }
 0x27a   :  { %547 = vperm.xlu0 %637, %v511_v50  }
 0x282   :  { %640 = vset.pattern.permute.xlu0 %v867_v38 }
 0x2a4   :  { %v536_v25 = vpop.permute.xlu2 %535 }
 0x2a5   :  { %v567_v29 = vmul.f32 %v536_v25, %v812_v11  ;;  %v568_v56 = vmul.f32 %v536_v25, %v814_v12 }
 0x2a7   :  { %583 = vst [vmem:[#allocation8 + $0x30] sm:$0xff] %v567_v29 }
 0x2a8   :  { %584 = vst [vmem:[#allocation8 + $0x38] sm:$0xff] %v568_v56 }
 0x2b4   :  { %v554_v58 = vpop.permute.xlu2 %553 }
 0x2b5   :  { %v573_v44 = vmul.f32 %v554_v58, %v830_v21  ;;  %v574_v47 = vmul.f32 %v554_v58, %v832_v22 }
 0x2b7   :  { %589 = vst [vmem:[#allocation8 + $0x60] sm:$0xff] %v573_v44 }
 0x2b8   :  { %590 = vst [vmem:[#allocation8 + $0x68] sm:$0xff] %v574_v47 }
 0x2bc   :  { %v518_v28 = vpop.permute.xlu0 %517 }
 0x2bd   :  { %v561_v27 = vmul.f32 %v518_v28, %v800_v5  ;;  %v562_v51 = vmul.f32 %v518_v28, %v802_v6 }
 0x2bf   :  { %577 = vst [vmem:[#allocation8] sm:$0xff] %v561_v27 }
 0x2c0   :  { %578 = vst [vmem:[#allocation8 + $0x8] sm:$0xff] %v562_v51 }
 0x2c5   :  { %v542_v38 = vpop.permute.xlu1 %541 }
 0x2c6   :  { %v569_v11 = vmul.f32 %v542_v38, %v790_v0  ;;  %v570_v12 = vmul.f32 %v542_v38, %v792_v1 }
 0x2c8   :  { %585 = vst [vmem:[#allocation8 + $0x40] sm:$0xff] %v569_v11 }
 0x2c9   :  { %586 = vst [vmem:[#allocation8 + $0x48] sm:$0xff] %v570_v12 }
 0x2cc   :  { %v524_v53 = vpop.permute.xlu0 %523 }
 0x2cd   :  { %v563_v21 = vmul.f32 %v524_v53, %v816_v13  ;;  %v564_v22 = vmul.f32 %v524_v53, %v818_v14 }
 0x2cf   :  { %579 = vst [vmem:[#allocation8 + $0x10] sm:$0xff] %v563_v21 }
 0x2d0   :  { %580 = vst [vmem:[#allocation8 + $0x18] sm:$0xff] %v564_v22 }
 0x2d5   :  { %v560_v54 = vpop.permute.xlu1 %559 }
 0x2d6   :  { %v575_v5 = vmul.f32 %v560_v54, %v826_v18  ;;  %v576_v6 = vmul.f32 %v560_v54, %v828_v20 }
 0x2d8   :  { %591 = vst [vmem:[#allocation8 + $0x70] sm:$0xff] %v575_v5 }
 0x2d9   :  { %592 = vst [vmem:[#allocation8 + $0x78] sm:$0xff] %v576_v6 }
 0x2dc   :  { %v530_v55 = vpop.permute.xlu0 %529 }
 0x2dd   :  { %v565_v0 = vmul.f32 %v530_v55, %v794_v2  ;;  %v566_v1 = vmul.f32 %v530_v55, %v798_v4 }
 0x2df   :  { %581 = vst [vmem:[#allocation8 + $0x20] sm:$0xff] %v565_v0 }
 0x2e0   :  { %582 = vst [vmem:[#allocation8 + $0x28] sm:$0xff] %v566_v1 }
 0x2ec   :  { %v548_v13 = vpop.permute.xlu0 %547 }
 0x2ed   :  { %v571_v14 = vmul.f32 %v548_v13, %v808_v9  ;;  %v572_v18 = vmul.f32 %v548_v13, %v810_v10 }
 0x2ef   :  { %587 = vst [vmem:[#allocation8 + $0x50] sm:$0xff] %v571_v14 }
 0x2f0   :  { %588 = vst [vmem:[#allocation8 + $0x58] sm:$0xff] %v572_v18 }
 0x2f1   :  { %605 = dma.vmem_to_hbm [thread:$0]  %s598_s2, 2048, %s600_s30, [#allocation4], %s754_s26, %s754_s26, %s755_s27  }
 0x2f2   :  { %749 = dma.done.wait [#allocation4], 2048  }
 0x2f3   :  { %750 = vsyncadd [#allocation4], 4294965248 }
 0x2f4   :  { %610 = vsyncpa [#allocation3], 1 }
 0x2f5   :  { %611 = vsyncpa [#allocation6], 1 }
 0x2f6   :  { %612 = vsyncpa [#allocation4], 1 }

</bundles_post_ra>
